<compile_context>
chip_gen: v5e
topology: v5e:2x2
jax: 0.10.0
libtpu: 0.0.40
codegen_flags: <defaults>
</compile_context>

<pallas_src>
import functools

import jax
import jax.numpy as jnp
from jax.experimental import pallas as pl
from jax.experimental.pallas import tpu as pltpu


def _tv_kernel(mask_ref, x_ref, o_ref, *, W):
    # x block: (rows, L) with L = H*W ; compute in f32.
    x = x_ref[...].astype(jnp.float32)
    L = x.shape[-1]

    h_valid = mask_ref[0:1, :]   # (1, L): 1.0 where a vertical neighbour exists
    w_valid = mask_ref[1:2, :]   # (1, L): 1.0 where a horizontal neighbour exists

    # neighbour at flat index + W (next image row): roll by L-W == roll by -W
    x_down = pltpu.roll(x, shift=L - W, axis=1)
    # neighbour at flat index + 1 (next pixel in the row): roll by L-1 == roll by -1
    x_right = pltpu.roll(x, shift=L - 1, axis=1)

    dh = (x_down - x) * h_valid
    dw = (x_right - x) * w_valid

    h_sum = jnp.sum(dh * dh)
    w_sum = jnp.sum(dw * dw)

    # Write the two partial sums into lanes (0,0)/(0,1) of this block's
    # (1, 8, 128) output tile; everything else is zero.
    ii = jax.lax.broadcasted_iota(jnp.int32, (1, 8, 128), 1)
    jj = jax.lax.broadcasted_iota(jnp.int32, (1, 8, 128), 2)
    o_ref[...] = jnp.where(
        (ii == 0) & (jj == 0), h_sum,
        jnp.where((ii == 0) & (jj == 1), w_sum, jnp.float32(0.0)))


def _pick_rows(n_rows, row_bytes, target_bytes=2 * 1024 * 1024):
    # Row-block size must evenly divide n_rows and be a multiple of 8 (or be the
    # full extent) so the BlockSpec satisfies the (8, 128) tiling rule.
    cands = [d for d in range(8, n_rows, 8) if n_rows % d == 0] + [n_rows]
    fitting = [d for d in cands if d * row_bytes <= target_bytes]
    return max(fitting) if fitting else min(cands)


def tv_loss(x, tv_loss_weight=1.0):
    """x: (B, C, H, W). Returns a scalar float32 (same semantics as TVLoss.forward)."""
    B, C, H, W = x.shape
    count_h = C * (H - 1) * W
    count_w = C * H * (W - 1)

    N, L = B * C, H * W
    x2 = x.reshape(N, L)                      # lane-dense layout: one image per row

    rows = _pick_rows(N, L * 4)               # f32 working size per row
    grid = N // rows

    # 0/1 validity masks for the flattened layout (built XLA-side, tiny).
    idx = jnp.arange(L, dtype=jnp.int32)
    h_valid = (idx < (L - W)).astype(jnp.float32)          # not in last image row
    w_valid = ((idx % W) != (W - 1)).astype(jnp.float32)   # not in last image column
    masks = jnp.stack([h_valid, w_valid], axis=0)          # (2, L)

    kernel = functools.partial(_tv_kernel, W=W)

    partials = pl.pallas_call(
        kernel,
        out_shape=jax.ShapeDtypeStruct((grid, 8, 128), jnp.float32),
        grid_spec=pltpu.PrefetchScalarGridSpec(
            num_scalar_prefetch=0,
            grid=(grid,),
            in_specs=[
                pl.BlockSpec((2, L), lambda i: (0, 0)),     # boundary masks (reused)
                pl.BlockSpec((rows, L), lambda i: (i, 0)),  # a slab of image rows
            ],
            out_specs=pl.BlockSpec((1, 8, 128), lambda i: (i, 0, 0)),
        ),
        compiler_params=pltpu.CompilerParams(
            dimension_semantics=("parallel",),       # independent blocks -> megacore OK
            vmem_limit_bytes=48 * 1024 * 1024,
        ),
    )(masks, x2)

    h_tv = jnp.sum(partials[:, 0, 0])
    w_tv = jnp.sum(partials[:, 0, 1])
    # Tiny scalar epilogue in plain JAX, mirroring the reference formula.
    # Note: H==1 or W==1 divides by zero, same behaviour as the PyTorch module.
    return tv_loss_weight * 2.0 * (h_tv / count_h + w_tv / count_w) / B


def tv_loss_ref(x, tv_loss_weight=1.0):
    B, C, H, W = x.shape
    count_h = C * (H - 1) * W
    count_w = C * H * (W - 1)
    xf = x.astype(jnp.float32)
    h_tv = jnp.sum((xf[:, :, 1:, :] - xf[:, :, :-1, :]) ** 2)
    w_tv = jnp.sum((xf[:, :, :, 1:] - xf[:, :, :, :-1]) ** 2)
    return tv_loss_weight * 2.0 * (h_tv / count_h + w_tv / count_w) / B


if __name__ == "__main__":
    key = jax.random.PRNGKey(0)
    x = jax.random.normal(key, (2, 4, 16, 16), dtype=jnp.float32)

    out = jax.block_until_ready(tv_loss(x, tv_loss_weight=1.0))
    ref = jax.block_until_ready(tv_loss_ref(x, tv_loss_weight=1.0))

    assert jnp.allclose(out, ref, rtol=1e-5, atol=1e-5), (out, ref)
    print("KERNEL_OK")
</pallas_src>

<mosaic_0001>
module attributes {stable_mosaic.version = 11 : i64} {
  func.func @_tv_kernel(%arg0: i32, %arg1: memref<2x256xf32, #tpu.memory_space<vmem>>, %arg2: memref<8x256xf32, #tpu.memory_space<vmem>>, %arg3: memref<1x8x128xf32, #tpu.memory_space<vmem>>) attributes {dimension_semantics = [#tpu.dimension_semantics<parallel>], iteration_bounds = array<i64: 1>, scalar_prefetch = 0 : i64, scratch_operands = 0 : i64, tpu.core_type = #tpu.core_type<tc>, window_params = [{pipeline_mode = #tpu.pipeline_mode<synchronous>, transform_indices = @transform_0, window_bounds = array<i64: 2, 256>}, {transform_indices = @transform_1, window_bounds = array<i64: 8, 256>}, {transform_indices = @transform_2, window_bounds = array<i64: 1, 8, 128>}]} {
    %c0 = arith.constant 0 : index
    %c0_0 = arith.constant 0 : index
    %0 = vector.load %arg2[%c0, %c0_0] : memref<8x256xf32, #tpu.memory_space<vmem>>, vector<8x256xf32>
    %c0_1 = arith.constant 0 : index
    %c0_2 = arith.constant 0 : index
    %1 = vector.load %arg1[%c0_1, %c0_2] : memref<2x256xf32, #tpu.memory_space<vmem>>, vector<1x256xf32>
    %c1 = arith.constant 1 : index
    %c0_3 = arith.constant 0 : index
    %2 = vector.load %arg1[%c1, %c0_3] : memref<2x256xf32, #tpu.memory_space<vmem>>, vector<1x256xf32>
    %c240_i32 = arith.constant 240 : i32
    %3 = tpu.dynamic_rotate %0 by %c240_i32 dim 1 : vector<8x256xf32>, i32 -> vector<8x256xf32>
    %c255_i32 = arith.constant 255 : i32
    %4 = tpu.dynamic_rotate %0 by %c255_i32 dim 1 : vector<8x256xf32>, i32 -> vector<8x256xf32>
    %5 = arith.subf %3, %0 : vector<8x256xf32>
    %6 = vector.broadcast %1 : vector<1x256xf32> to vector<8x256xf32>
    %7 = arith.mulf %5, %6 : vector<8x256xf32>
    %8 = arith.subf %4, %0 : vector<8x256xf32>
    %9 = vector.broadcast %2 : vector<1x256xf32> to vector<8x256xf32>
    %10 = arith.mulf %8, %9 : vector<8x256xf32>
    %11 = arith.mulf %7, %7 : vector<8x256xf32>
    %12 = vector.shape_cast %11 : vector<8x256xf32> to vector<1x8x256xf32>
    %cst = arith.constant dense<0.000000e+00> : vector<1xf32>
    %13 = vector.multi_reduction <add>, %12, %cst [1, 2] : vector<1x8x256xf32> to vector<1xf32>
    %14 = vector.shape_cast %13 : vector<1xf32> to vector<1x1x1xf32>
    %15 = vector.extract %14[0, 0, 0] : f32 from vector<1x1x1xf32>
    %16 = arith.mulf %10, %10 : vector<8x256xf32>
    %17 = vector.shape_cast %16 : vector<8x256xf32> to vector<1x8x256xf32>
    %cst_4 = arith.constant dense<0.000000e+00> : vector<1xf32>
    %18 = vector.multi_reduction <add>, %17, %cst_4 [1, 2] : vector<1x8x256xf32> to vector<1xf32>
    %19 = vector.shape_cast %18 : vector<1xf32> to vector<1x1x1xf32>
    %20 = vector.extract %19[0, 0, 0] : f32 from vector<1x1x1xf32>
    %21 = tpu.iota {dimensions = array<i32: 1>} : vector<1x8x128xi32>
    %22 = tpu.iota {dimensions = array<i32: 2>} : vector<1x8x128xi32>
    %c0_i32 = arith.constant 0 : i32
    %23 = vector.broadcast %c0_i32 : i32 to vector<1x8x128xi32>
    %24 = arith.cmpi eq, %21, %23 : vector<1x8x128xi32>
    %c0_i32_5 = arith.constant 0 : i32
    %25 = vector.broadcast %c0_i32_5 : i32 to vector<1x8x128xi32>
    %26 = arith.cmpi eq, %22, %25 : vector<1x8x128xi32>
    %27 = arith.andi %24, %26 : vector<1x8x128xi1>
    %c0_i32_6 = arith.constant 0 : i32
    %28 = vector.broadcast %c0_i32_6 : i32 to vector<1x8x128xi32>
    %29 = arith.cmpi eq, %21, %28 : vector<1x8x128xi32>
    %c1_i32 = arith.constant 1 : i32
    %30 = vector.broadcast %c1_i32 : i32 to vector<1x8x128xi32>
    %31 = arith.cmpi eq, %22, %30 : vector<1x8x128xi32>
    %32 = arith.andi %29, %31 : vector<1x8x128xi1>
    %cst_7 = arith.constant 0.000000e+00 : f32
    %33 = vector.broadcast %20 : f32 to vector<1x8x128xf32>
    %34 = vector.broadcast %cst_7 : f32 to vector<1x8x128xf32>
    %35 = arith.select %32, %33, %34 : vector<1x8x128xi1>, vector<1x8x128xf32>
    %36 = vector.broadcast %15 : f32 to vector<1x8x128xf32>
    %37 = arith.select %27, %36, %35 : vector<1x8x128xi1>, vector<1x8x128xf32>
    %c0_8 = arith.constant 0 : index
    %c0_9 = arith.constant 0 : index
    %c0_10 = arith.constant 0 : index
    %38 = vector.load %arg3[%c0_8, %c0_9, %c0_10] : memref<1x8x128xf32, #tpu.memory_space<vmem>>, vector<1x8x128xf32>
    tpu.vector_store %arg3[%c0_8, %c0_9, %c0_10], %37 {strides = array<i32>} : memref<1x8x128xf32, #tpu.memory_space<vmem>>, vector<1x8x128xf32>,
    return
  }
  func.func @transform_0(%arg0: i32) -> (i32, i32) {
    %c0_i32 = arith.constant 0 : i32
    %c0_i32_0 = arith.constant 0 : i32
    %c0_i32_1 = arith.constant 0 : i32
    return %c0_i32, %c0_i32_0 : i32, i32
  }
  func.func @transform_1(%arg0: i32) -> (i32, i32) {
    %c0_i32 = arith.constant 0 : i32
    %c0_i32_0 = arith.constant 0 : i32
    return %arg0, %c0_i32 : i32, i32
  }
  func.func @transform_2(%arg0: i32) -> (i32, i32, i32) {
    %c0_i32 = arith.constant 0 : i32
    %c0_i32_0 = arith.constant 0 : i32
    %c0_i32_1 = arith.constant 0 : i32
    return %arg0, %c0_i32, %c0_i32_0 : i32, i32, i32
  }
}

</mosaic_0001>

<bundles_post_ra>
// kernel: tpu_custom_call.1
= control target key start
LH: loop header
LB: loop body
LE: loop exit
PB: predicated region body
PF: predicated region fallthrough
CT: control target
= control target key end

     0   :  { %7 = vsyncpa [#allocation3], 0  ;;  %s249_s0 = inlined_call_operand.hbm [shape: f32[2,256], index: 0, kind: input, shape index: {}]   ;;  %s250_s1 = inlined_call_operand.hbm [shape: f32[8,256], index: 1, kind: input, shape index: {}]   ;;  %s251_s2 = inlined_call_operand.hbm [shape: f32[1,8,128], index: 2, kind: output, shape index: {}]  }
   0x1   :  { %8 = vsyncpa [#allocation6], 0 }
   0x2   :  { %9 = vsyncpa [#allocation4], 0  ;;  %s15_s11 = sshll.u32 %s249_s0, 4  ;;  %s220_s12 = smov [#allocation2]   ;;  %s16_s11 = int_to_ptr.hbm [resolvable:$true] %s15_s11 }
   0x3   :  { %s17_s13 = sshll.u32 %s220_s12, 4  ;;  %s26_s16 = sshll.u32 %s250_s1, 4  ;;  %s18_s13 = int_to_ptr.vmem [resolvable:$true] %s17_s13  ;;  %s27_s16 = int_to_ptr.hbm [resolvable:$true] %s26_s16 }
   0x4   :  { %20 = dma.hbm_to_vmem [thread:$0]  %s16_s11, 64, %s18_s13, [#allocation3]  }
   0x5   :  { %s221_s17 = smov [#allocation5]  }
   0x6   :  { %s28_s18 = sshll.u32 %s221_s17, 4  ;;  %s29_s18 = int_to_ptr.vmem [resolvable:$true] %s28_s18 }
   0x7   :  { %31 = dma.hbm_to_vmem [thread:$0]  %s27_s16, 256, %s29_s18, [#allocation6]  }
   0x8   :  { %214 = dma.done.wait [#allocation3], 64  }
   0x9   :  { %215 = vsyncadd [#allocation3], 4294967232 }
   0xa   :  { %216 = dma.done.wait [#allocation6], 256  }
   0xb   :  { %217 = vsyncadd [#allocation6], 4294967040  ;;  %v40_v0 = vld [vmem:[#allocation5] sm:$0xff]  ;;  %s222_s0 = smov 127   ;;  %s223_s19 = smov 112   ;;  %v41_v1 = vld [vmem:[#allocation5 + $0x8] sm:$0xff]  ;;  %v49_v2 = vlaneseq }
   0xc   :  { %54 = vrot.lane.b32.xlu1 %v40_v0, %s222_s0  ;;  %45 = vrot.lane.b32.xlu0 %v40_v0, %s223_s19  ;;  %v42_v6 = vld [vmem:[#allocation2] ss:$2 sm:$0x3]  ;;  %v44_v11 = vld [vmem:[#allocation2 + $0x1] ss:$2 sm:$0x3] }
   0xd   :  { %v50_v5 = vand.u32 127, %v49_v2  ;;  %v64_v9 = vperm.slane %v42_v6, 0  ;;  %v65_v10 = vperm.slane %v42_v6, 1  ;;  %v73_v18 = vperm.slane %v44_v11, 0  ;;  %s224_s1 = smov [#allocation7]   ;;  %s122_s24 = sshll.u32 %s251_s2, 4  ;;  %s123_s24 = int_to_ptr.hbm [resolvable:$true] %s122_s24 }
   0xe   :  { %v74_v19 = vperm.slane %v44_v11, 1  ;;  %v104_v46 = vshrl.u32 %v49_v2, 7  ;;  %s120_s20 = sshll.u32 %s224_s1, 4  ;;  %s121_s20 = int_to_ptr.vmem [resolvable:$true] %s120_s20 }
   0xf   :  { %vm58_vm0 = vcmp.lt.s32.totalorder %v50_v5, 127  ;;  %vm51_vm1 = vcmp.lt.s32.totalorder %v50_v5, 112  ;;  %vm108_vm3 = vcmp.eq.s32.totalorder %v50_v5, 1  ;;  %vm106_vm4 = vcmp.eq.s32.totalorder %v50_v5, 0 }
  0x10   :  { %vm105_vm2 = vcmp.eq.s32.totalorder %v104_v46, 0 }
  0x11   :  { %vm109_vm5 = vmand %vm105_vm2, %vm108_vm3 }
  0x12   :  { %vm107_vm6 = vmand %vm105_vm2, %vm106_vm4 }
  0x14   :  { %56 = vrot.lane.b32.xlu1 %v41_v1, %s222_s0  ;;  %47 = vrot.lane.b32.xlu0 %v41_v1, %s223_s19 }
  0x7e   :  { %v55_v3 = vpop.permute.xlu1 %54  ;;  %v46_v4 = vpop.permute.xlu0 %45 }
  0x86   :  { %v57_v7 = vpop.permute.xlu1 %56  ;;  %v48_v8 = vpop.permute.xlu0 %47 }
  0x87   :  { %v59_v12 = vsel %vm58_vm0, %v55_v3, %v57_v7  ;;  %v60_v13 = vsel %vm58_vm0, %v57_v7, %v55_v3  ;;  %v52_v14 = vsel %vm51_vm1, %v46_v4, %v48_v8  ;;  %v53_v15 = vsel %vm51_vm1, %v48_v8, %v46_v4 }
  0x88   :  { %v61_v16 = vsub.f32 %v52_v14, %v40_v0  ;;  %v62_v17 = vsub.f32 %v53_v15, %v41_v1  ;;  %v70_v20 = vsub.f32 %v59_v12, %v40_v0  ;;  %v71_v21 = vsub.f32 %v60_v13, %v41_v1 }
  0x8a   :  { %v68_v22 = vmul.f32 %v64_v9, %v61_v16  ;;  %v69_v23 = vmul.f32 %v65_v10, %v62_v17  ;;  %v77_v27 = vmul.f32 %v73_v18, %v70_v20  ;;  %v78_v28 = vmul.f32 %v74_v19, %v71_v21 }
  0x8c   :  { %v79_v24 = vmul.f32 %v68_v22, %v68_v22  ;;  %v80_v25 = vmul.f32 %v69_v23, %v69_v23  ;;  %v91_v29 = vmul.f32 %v77_v27, %v77_v27  ;;  %v92_v30 = vmul.f32 %v78_v28, %v78_v28 }
  0x8e   :  { %v81_v26 = vadd.f32 %v80_v25, %v79_v24  ;;  %v93_v31 = vadd.f32 %v92_v30, %v91_v29 }
  0x90   :  { %82 = vadd.xlane.f32.xlu2 %v81_v26 }
  0x98   :  { %94 = vadd.xlane.f32.xlu2 %v93_v31 }
 0x103   :  { %v83_v32 = vpop.xlane.xlu2 %82 }
 0x104   :  { %v84_v33 = vrot.slane %v83_v32, 4 }
 0x106   :  { %v85_v34 = vadd.f32 %v84_v33, %v83_v32 }
 0x108   :  { %v86_v35 = vrot.slane %v85_v34, 2 }
 0x10a   :  { %v87_v36 = vadd.f32 %v86_v35, %v85_v34 }
 0x10b   :  { %v95_v37 = vpop.xlane.xlu2 %94 }
 0x10c   :  { %v96_v38 = vrot.slane %v95_v37, 4  ;;  %v88_v39 = vrot.slane %v87_v36, 1 }
 0x10e   :  { %v97_v40 = vadd.f32 %v96_v38, %v95_v37  ;;  %v89_v41 = vadd.f32 %v88_v39, %v87_v36 }
 0x110   :  { %v98_v42 = vrot.slane %v97_v40, 2  ;;  %133 = vpush %v89_v41 }
 0x112   :  { %v99_v43 = vadd.f32 %v98_v42, %v97_v40 }
 0x114   :  { %v100_v44 = vrot.slane %v99_v43, 1 }
 0x116   :  { %v101_v45 = vadd.f32 %v100_v44, %v99_v43 }
 0x118   :  { %135 = vpush %v101_v45 }
 0x141   :  { %s134_s21 = spop %133 }
 0x142   :  { %v112_v48 = vstv %s134_s21 }
 0x149   :  { %s136_s25 = spop %135 }
 0x14a   :  { %v110_v47 = vstv %s136_s25 }
 0x14b   :  { %v111_v49 = vsel %vm109_vm5, %v110_v47, 0.0 }
 0x14c   :  { %v113_v50 = vsel %vm107_vm6, %v112_v48, %v111_v49 }
 0x14d   :  { %114 = vst [vmem:[#allocation7] sm:$0xff] %v113_v50 }
 0x14e   :  { %125 = dma.vmem_to_hbm [thread:$0]  %s121_s20, 128, %s123_s24, [#allocation4]  }
 0x14f   :  { %218 = dma.done.wait [#allocation4], 128  }
 0x150   :  { %219 = vsyncadd [#allocation4], 4294967168 }
 0x151   :  { %130 = vsyncpa [#allocation3], 1 }
 0x152   :  { %131 = vsyncpa [#allocation6], 1 }
 0x153   :  { %132 = vsyncpa [#allocation4], 1 }

</bundles_post_ra>
